<compile_context>
chip_gen: v7x
topology: tpu7x:2x2x1
jax: 0.10.0
libtpu: 0.0.40
codegen_flags: <defaults>
</compile_context>

<pallas_src>
import jax
import jax.numpy as jnp
from jax.experimental import pallas as pl
from jax.experimental.pallas import tpu as pltpu

_MAX_TILE_BYTES = 8 * 1024 * 1024  # 8 MiB/tile -> ~32 MiB live with in/out double-buffering


def _identity_kernel(x_ref, o_ref):
    # The entire "forward" of the abstract base model: pass data through unchanged.
    o_ref[...] = x_ref[...]


def _sublane(dtype) -> int:
    """Sublane packing factor for the dtype (rows per 32-bit sublane group)."""
    itemsize = jnp.dtype(dtype).itemsize
    return {4: 8, 2: 16, 1: 32}.get(itemsize, 8)


def _pick_layout(total: int, dtype):
    """Pick a lane-dense (cols % 128 == 0) 2D view.

    Preference order: rows divisible by the dtype sublane count, then rows large
    enough that the grid can be >= 2 (v7x megacore), then the widest cols.
    """
    sub = _sublane(dtype)
    best = None
    for cols in (2048, 1024, 512, 256, 128):
        if total % cols:
            continue
        rows = total // cols
        key = (rows % sub == 0, rows >= 2 * sub, cols)
        if best is None or key > best[0]:
            best = (key, cols, rows)
    if best is None:
        return None, None
    return best[1], best[2]


def _pick_tile_rows(rows: int, cols: int, itemsize: int, sub: int) -> int:
    """Largest sublane-aligned row-tile that divides `rows`, stays under
    _MAX_TILE_BYTES, and (when possible) leaves a grid of >= 2 steps."""
    target = max(sub, _MAX_TILE_BYTES // (cols * itemsize))
    cands = [rows] + [m for m in (8192, 4096, 2048, 1024, 512, 256, 128, 64, 32, 16, 8)
                      if m % sub == 0]
    fits = [t for t in cands if t <= rows and rows % t == 0 and t <= target]
    # rows % sub == 0 is guaranteed by the caller, so `sub` is always in `fits`.
    grid2 = [t for t in fits if rows // t >= 2]
    return max(grid2) if grid2 else max(fits)


def _tiled_copy_2d(x2: jax.Array) -> jax.Array:
    """Lane-dense, sublane-aligned, pipelined memcpy over a (rows, cols) slab."""
    rows, cols = x2.shape
    itemsize = jnp.dtype(x2.dtype).itemsize
    sub = _sublane(x2.dtype)
    tile_rows = _pick_tile_rows(rows, cols, itemsize, sub)
    grid = (rows // tile_rows,)

    tile_bytes = tile_rows * cols * itemsize
    # in + out, each double-buffered -> 4*tile live; cap below v7x's 64 MiB physical VMEM.
    vmem_limit = int(min(max(4 * tile_bytes + (8 << 20), 32 << 20), 48 << 20))

    cost = pl.CostEstimate(
        flops=0, transcendentals=0, bytes_accessed=2 * rows * cols * itemsize
    )
    return pl.pallas_call(
        _identity_kernel,
        out_shape=jax.ShapeDtypeStruct((rows, cols), x2.dtype),
        grid=grid,
        in_specs=[pl.BlockSpec((tile_rows, cols), lambda i: (i, 0))],
        out_specs=pl.BlockSpec((tile_rows, cols), lambda i: (i, 0)),
        cost_estimate=cost,
        compiler_params=pltpu.CompilerParams(
            dimension_semantics=("parallel",),
            vmem_limit_bytes=vmem_limit,
        ),
    )(x2)


def _padded_copy(x: jax.Array) -> jax.Array:
    """Fallback for sizes not divisible by 128 lanes / sublane rows: pad the flat
    view to a multiple of (sublane*128), copy tiled, slice back."""
    sub = _sublane(x.dtype)
    total = x.size
    flat = x.reshape(-1)
    chunk = sub * 128
    pad = (-total) % chunk
    if pad:
        flat = jnp.pad(flat, (0, pad))
    rows = flat.size // 128
    y = _tiled_copy_2d(flat.reshape(rows, 128))
    return y.reshape(-1)[:total].reshape(x.shape)


def pallas_identity_copy(x: jax.Array) -> jax.Array:
    """Materialized identity copy through a Pallas kernel (scaffold for subclasses
    that add real compute)."""
    if x.size == 0:
        return x
    cols, rows = _pick_layout(x.size, x.dtype)
    sub = _sublane(x.dtype)
    if cols is None or rows % sub != 0:
        return _padded_copy(x)
    return _tiled_copy_2d(x.reshape(rows, cols)).reshape(x.shape)


def experiment_base_model_forward(x: jax.Array) -> jax.Array:
    """Forward of the abstract ExperimentBaseModel.

    The base class defines no compute (forward raises NotImplementedError in
    PyTorch), so the faithful — and zero-cost — implementation is to return the
    input unchanged.  Subclasses should replace this with a real Pallas kernel
    (see `pallas_identity_copy` / `_tiled_copy_2d` for the tiling scaffold).
    """
    # TODO(synk): abstract forward — no compute to lower; identity pass-through only.
    return x


if __name__ == "__main__":
    key = jax.random.PRNGKey(0)
    # Small NCHW input consistent with an image-dataset base model.
    x = jax.random.normal(key, (2, 4, 16, 16), dtype=jnp.float32)

    # Zero-cost forward of the abstract base model.
    y_fwd = experiment_base_model_forward(x)
    assert y_fwd.shape == x.shape and y_fwd.dtype == x.dtype

    # Exercise the Pallas scaffold kernel once (lane-dense, sublane-aligned tiles).
    copy_fn = jax.jit(pallas_identity_copy)
    y = jax.block_until_ready(copy_fn(x))
    assert y.shape == x.shape
    assert y.dtype == x.dtype
    assert bool(jnp.allclose(y, x)), "identity copy mismatch"

    # Also exercise the padded fallback path (size not divisible by 128).
    x_odd = jax.random.normal(key, (3, 5, 7), dtype=jnp.float32)
    y_odd = jax.block_until_ready(jax.jit(pallas_identity_copy)(x_odd))
    assert bool(jnp.allclose(y_odd, x_odd)), "padded identity copy mismatch"

    print("KERNEL_OK")
</pallas_src>

<mosaic_0001>
module attributes {stable_mosaic.version = 11 : i64} {
  func.func @_identity_kernel(%arg0: i32, %arg1: memref<8x128xf32, #tpu.memory_space<vmem>>, %arg2: memref<8x128xf32, #tpu.memory_space<vmem>>) attributes {dimension_semantics = [#tpu.dimension_semantics<parallel>], iteration_bounds = array<i64: 2>, scalar_prefetch = 0 : i64, scratch_operands = 0 : i64, tpu.core_type = #tpu.core_type<tc>, window_params = [{transform_indices = @transform_0, window_bounds = array<i64: 8, 128>}, {transform_indices = @transform_1, window_bounds = array<i64: 8, 128>}]} {
    %c0 = arith.constant 0 : index
    %c0_0 = arith.constant 0 : index
    %0 = vector.load %arg1[%c0, %c0_0] : memref<8x128xf32, #tpu.memory_space<vmem>>, vector<8x128xf32>
    %c0_1 = arith.constant 0 : index
    %c0_2 = arith.constant 0 : index
    %1 = vector.load %arg2[%c0_1, %c0_2] : memref<8x128xf32, #tpu.memory_space<vmem>>, vector<8x128xf32>
    tpu.vector_store %arg2[%c0_1, %c0_2], %0 {strides = array<i32>} : memref<8x128xf32, #tpu.memory_space<vmem>>, vector<8x128xf32>,
    return
  }
  func.func @transform_0(%arg0: i32) -> (i32, i32) {
    %c0_i32 = arith.constant 0 : i32
    %c0_i32_0 = arith.constant 0 : i32
    return %arg0, %c0_i32 : i32, i32
  }
  func.func @transform_1(%arg0: i32) -> (i32, i32) {
    %c0_i32 = arith.constant 0 : i32
    %c0_i32_0 = arith.constant 0 : i32
    return %arg0, %c0_i32 : i32, i32
  }
}

</mosaic_0001>

<bundles_post_ra>
// kernel: pallas_identity_copy.1
= control target key start
LH: loop header
LB: loop body
LE: loop exit
PB: predicated region body
PF: predicated region fallthrough
CT: control target
= control target key end

     0   :  { %s188_s6 = smov 0   ;;  %s208_s0 = inlined_call_operand.vmem [shape: f32[16,128], index: 0, kind: input, shape index: {}]   ;;  %s209_s1 = inlined_call_operand.vmem [shape: f32[16,128], index: 1, kind: output, shape index: {}]  }
   0x1 LB: > { %s167_s7 = sadd.s32 4294967295, %s190_s6   ;;  %p171_p0 = scmp.ge.s32.totalorder %s190_s6, 1  ;;  %s190_s6 = sphi %s188_s6, %s11_s6  }
   0x2   : > { %p86_p1 = scmp.lt.s32.totalorder %s190_s6, 3 }
   0x4   : > { %p87_p2 = pnand %p171_p0, %p86_p1 }
   0x5   : > { %p104_p3 = scmp.lt.s32.totalorder (!%p87_p2), %s167_s7, 1 }
   0x6   : > { %90 = sbr.rel (%p87_p2) target bundleno = 18 (0x12), region = 24 }
   0xd   : > { %s211_s7 = smov (!%p104_p3, %s167_s7), 1 }
   0xe   : > { %s172_s8 = sshll.u32 %s211_s7, 3 }
   0xf   : > { %s107_s11 = scalar_lea.vmem %s208_s0, %s172_s8  ;;  %s111_s14 = scalar_lea.vmem %s209_s1, %s172_s8 }
  0x10   : > { %v112_v0 = vld [vmem:[%s107_s11] sm:$0xff] }
  0x11   : > { %113 = vst [vmem:[%s111_s14] sm:$0xff] %v112_v0 }
  0x12 PF: > { %s11_s6 = sadd.s32 1, %s190_s6  }
  0x13   : > { %p8_p4 = scmp.ge.s32.totalorder %s11_s6, 4  }
  0x15   :  { %10 = sbr.rel (!%p8_p4) target bundleno = 1 (0x1), region = 54 }

</bundles_post_ra>
